<compile_context>
chip_gen: v6e
topology: v6e:2x2x1
jax: 0.10.0
libtpu: 0.0.40
codegen_flags: <defaults>
</compile_context>

<pallas_src>
import functools
import jax
import jax.numpy as jnp
from jax.experimental import pallas as pl
from jax.experimental.pallas import tpu as pltpu

EPS = 1e-5  # PyTorch nn.LayerNorm default


def _layernorm(v, w, b):
    mu = jnp.mean(v, axis=-1, keepdims=True)
    var = jnp.mean(jnp.square(v - mu), axis=-1, keepdims=True)
    return (v - mu) * jax.lax.rsqrt(var + EPS) * w + b


def _vmem_limit_bytes():
    cap = 128 * 1024 * 1024
    try:
        cap = int(getattr(pltpu.get_tpu_info(), "vmem_capacity_bytes", cap))
    except Exception:
        pass
    if cap <= 64 * 1024 * 1024:
        # v7x-class: 64 MiB physical VMEM per TensorCore -> leave headroom.
        return 48 * 1024 * 1024
    # v5e/v6e-class: 128 MiB physical VMEM.
    return 100 * 1024 * 1024


def _choose_bt(batch, n_pad, d, hidden, num_heads, vmem_budget):
    """Largest divisor of `batch` whose working set fits the VMEM budget."""
    # Double-buffered bf16 per-layer weights (qkv, proj, fc1, fc2).
    w_bytes = 2 * 2 * (d * 3 * d + d * d + 2 * d * hidden)
    best = 1
    for bt in range(1, batch + 1):
        if batch % bt:
            continue
        m = bt * n_pad
        act = 3 * m * d * 4                                    # acc + 2x input buf
        tmp = (3 * m * d + bt * num_heads * n_pad * n_pad      # qkv + scores
               + m * hidden + 4 * m * d) * 4                   # mlp hidden + misc
        if w_bytes + act + tmp <= int(0.7 * vmem_budget):
            best = bt
    # NOTE: on v7x (2 TCs/chip) it can pay to halve Bt so the parallel batch
    # axis has extent >= 2 and both TensorCores are used.
    return best


# ----------------------------- kernels --------------------------------------


def patch_embed_kernel(x_ref, w_ref, b_ref, o_ref):
    # x: (tm, C*ph*pw) bf16, w: (C*ph*pw, D) bf16, b: (1, D) f32
    o_ref[...] = (
        jnp.dot(x_ref[...], w_ref[...], preferred_element_type=jnp.float32)
        + b_ref[...]
    )


def blocks_kernel(
    x_ref,        # (Bt, N_pad, D) f32
    small_ref,    # (1, 8, P)      f32   packed per-layer LN weights + biases
    qkvw_ref,     # (1, D, 3D)     bf16
    projw_ref,    # (1, D, D)      bf16
    fc1w_ref,     # (1, D, hidden) bf16
    fc2w_ref,     # (1, hidden, D) bf16
    fin_ref,      # (2, D)         f32   final LN weight / bias
    o_ref,        # (Bt, 1, D) if cls_only else (Bt, N_pad, D)
    acc_ref,      # (Bt, N_pad, D) f32   residual stream (VMEM-resident)
    *,
    num_heads,
    n_real,
    cls_only,
):
    # grid = (B // Bt, depth); batch groups on axis 0, layers iterated on axis 1.
    l = pl.program_id(1)

    @pl.when(l == 0)
    def _():
        acc_ref[...] = x_ref[...]

    bt, n_pad, d = acc_ref.shape
    hd = d // num_heads
    hidden = fc1w_ref.shape[2]
    m = bt * n_pad
    g = bt * num_heads
    scale = hd ** -0.5

    def sp(row, width):  # packed small-param slice -> (1, width)
        return small_ref[0, row:row + 1, :width]

    ln1w, ln1b = sp(0, d), sp(1, d)
    ln2w, ln2b = sp(2, d), sp(3, d)
    projb, fc2b = sp(4, d), sp(5, d)
    qkvb = sp(6, 3 * d)
    fc1b = sp(7, hidden)

    x = acc_ref[...].reshape(m, d)          # flattened residual stream (f32)

    # ---- attention branch (pre-LN) ----
    h = _layernorm(x, ln1w, ln1b)
    qkv = (
        jnp.dot(h.astype(jnp.bfloat16), qkvw_ref[0],
                preferred_element_type=jnp.float32)
        + qkvb
    )                                        # (m, 3D) f32

    def heads(t):                            # (m, D) -> (Bt*H, N, hd) bf16
        t = t.reshape(bt, n_pad, num_heads, hd)
        t = jnp.transpose(t, (0, 2, 1, 3))
        return t.reshape(g, n_pad, hd).astype(jnp.bfloat16)

    q = heads(qkv[:, 0 * d:1 * d] * scale)
    k = heads(qkv[:, 1 * d:2 * d])
    v = heads(qkv[:, 2 * d:3 * d])

    s = jnp.einsum("gqd,gkd->gqk", q, k,
                   preferred_element_type=jnp.float32)          # (G, N, N) f32

    if n_pad != n_real:
        # mask padded key columns (n_real is a compile-time constant)
        col = jax.lax.broadcasted_iota(jnp.int32, (1, 1, n_pad), 2)
        s = jnp.where(col < n_real, s, -1e30)

    s = s - jnp.max(s, axis=-1, keepdims=True)
    p = jnp.exp(s)
    p = p * pl.reciprocal(jnp.sum(p, axis=-1, keepdims=True), approx=True)

    attn = jnp.einsum("gqk,gkd->gqd", p.astype(jnp.bfloat16), v,
                      preferred_element_type=jnp.float32)        # (G, N, hd)
    attn = attn.reshape(bt, num_heads, n_pad, hd)
    attn = jnp.transpose(attn, (0, 2, 1, 3)).reshape(m, d)
    attn = (
        jnp.dot(attn.astype(jnp.bfloat16), projw_ref[0],
                preferred_element_type=jnp.float32)
        + projb
    )
    x = x + attn                             # residual (drop_path = identity)

    # ---- MLP branch (pre-LN) ----
    h = _layernorm(x, ln2w, ln2b)
    h = (
        jnp.dot(h.astype(jnp.bfloat16), fc1w_ref[0],
                preferred_element_type=jnp.float32)
        + fc1b
    )
    h = jax.nn.gelu(h, approximate=False)    # exact erf, matches nn.GELU()
    h = (
        jnp.dot(h.astype(jnp.bfloat16), fc2w_ref[0],
                preferred_element_type=jnp.float32)
        + fc2b
    )
    x = x + h

    acc_ref[...] = x.reshape(bt, n_pad, d)

    # ---- fused final LayerNorm epilogue on the last layer ----
    @pl.when(l == pl.num_programs(1) - 1)
    def _():
        finw = fin_ref[0:1, :]
        finb = fin_ref[1:2, :]
        if cls_only:
            cls = x.reshape(bt, n_pad, d)[:, 0:1, :]            # (Bt, 1, D)
            o_ref[...] = _layernorm(cls, finw, finb)
        else:
            o_ref[...] = _layernorm(x, finw, finb).reshape(bt, n_pad, d)


# ----------------------------- wrappers --------------------------------------


def run_patch_embed(patches_bf16, w_bf16, b_f32, vmem_limit):
    M, K = patches_bf16.shape
    D = w_bf16.shape[1]
    tm = 256
    if M < tm:
        tm = ((M + 7) // 8) * 8
    m_pad = ((M + tm - 1) // tm) * tm
    if m_pad != M:
        patches_bf16 = jnp.pad(patches_bf16, ((0, m_pad - M), (0, 0)))

    out = pl.pallas_call(
        patch_embed_kernel,
        out_shape=jax.ShapeDtypeStruct((m_pad, D), jnp.float32),
        grid=(m_pad // tm,),
        in_specs=[
            pl.BlockSpec((tm, K), lambda i: (i, 0)),
            pl.BlockSpec((K, D), lambda i: (0, 0)),
            pl.BlockSpec((1, D), lambda i: (0, 0)),
        ],
        out_specs=pl.BlockSpec((tm, D), lambda i: (i, 0)),
        compiler_params=pltpu.CompilerParams(
            dimension_semantics=("parallel",),
            vmem_limit_bytes=vmem_limit,
        ),
    )(patches_bf16, w_bf16, b_f32)
    return out[:M]


def run_blocks(x, bp, final_ln, num_heads, n_real, return_all_tokens,
               vmem_limit):
    # x: (B, N_pad, D) f32; bp: dict of layer-stacked parameters.
    B, N_pad, D = x.shape
    depth = bp["qkv_w"].shape[0]
    hidden = bp["fc1_w"].shape[2]
    P = bp["small"].shape[2]

    bt = _choose_bt(B, N_pad, D, hidden, num_heads, vmem_limit)
    grid = (B // bt, depth)

    def per_layer(shape):
        return pl.BlockSpec(shape, lambda g, l: (l, 0, 0))

    in_specs = [
        pl.BlockSpec((bt, N_pad, D), lambda g, l: (g, 0, 0)),   # activations
        per_layer((1, 8, P)),                                   # packed small
        per_layer((1, D, 3 * D)),                               # qkv_w
        per_layer((1, D, D)),                                   # proj_w
        per_layer((1, D, hidden)),                              # fc1_w
        per_layer((1, hidden, D)),                              # fc2_w
        pl.BlockSpec((2, D), lambda g, l: (0, 0)),              # final LN w/b
    ]

    if return_all_tokens:
        out_shape = jax.ShapeDtypeStruct((B, N_pad, D), jnp.float32)
        out_spec = pl.BlockSpec((bt, N_pad, D), lambda g, l: (g, 0, 0))
    else:
        out_shape = jax.ShapeDtypeStruct((B, 1, D), jnp.float32)
        out_spec = pl.BlockSpec((bt, 1, D), lambda g, l: (g, 0, 0))

    kernel = functools.partial(blocks_kernel, num_heads=num_heads,
                               n_real=n_real,
                               cls_only=not return_all_tokens)
    return pl.pallas_call(
        kernel,
        out_shape=out_shape,
        grid=grid,
        in_specs=in_specs,
        out_specs=out_spec,
        scratch_shapes=[pltpu.VMEM((bt, N_pad, D), jnp.float32)],
        compiler_params=pltpu.CompilerParams(
            dimension_semantics=("parallel", "arbitrary"),
            vmem_limit_bytes=vmem_limit,
        ),
    )(x, bp["small"], bp["qkv_w"], bp["proj_w"], bp["fc1_w"], bp["fc2_w"],
      final_ln)


# ----------------------------- model ----------------------------------------


def init_params(key, *, in_chans, patch_size, embed_dim, depth, num_heads,
                mlp_ratio, num_patches):
    del num_heads
    ph, pw = patch_size
    hidden = int(embed_dim * mlp_ratio)
    n_tokens = num_patches + 1
    std = 0.02  # TODO(synk): trunc_normal(std=0.02) approximated with normal*std

    keys = iter(jax.random.split(key, 3 + 4 * depth))

    def w_init(shape):
        return (std * jax.random.normal(next(keys), shape,
                                        jnp.float32)).astype(jnp.bfloat16)

    params = {
        # Conv2d(C, D, kernel=patch, stride=patch) as a matmul; weight
        # flattened with (c, kh, kw) ordering to match PyTorch.
        "patch_w": w_init((in_chans * ph * pw, embed_dim)),
        "patch_b": jnp.zeros((1, embed_dim), jnp.float32),
        "cls_token": std * jax.random.normal(next(keys), (1, 1, embed_dim),
                                             jnp.float32),
        "pos_embed": std * jax.random.normal(next(keys),
                                             (1, n_tokens, embed_dim),
                                             jnp.float32),
        # final LayerNorm packed: row 0 = weight (ones), row 1 = bias (zeros)
        "final_ln": jnp.concatenate(
            [jnp.ones((1, embed_dim), jnp.float32),
             jnp.zeros((1, embed_dim), jnp.float32)], axis=0),
    }

    qkv_w, proj_w, fc1_w, fc2_w = [], [], [], []
    for _ in range(depth):
        qkv_w.append(w_init((embed_dim, 3 * embed_dim)))
        proj_w.append(w_init((embed_dim, embed_dim)))
        fc1_w.append(w_init((embed_dim, hidden)))
        fc2_w.append(w_init((hidden, embed_dim)))

    # Packed per-layer small params (rows):
    #  0 ln1_w, 1 ln1_b, 2 ln2_w, 3 ln2_b, 4 proj_b, 5 fc2_b, 6 qkv_b, 7 fc1_b
    p_width = ((max(3 * embed_dim, hidden) + 127) // 128) * 128
    small = jnp.zeros((depth, 8, p_width), jnp.float32)
    small = small.at[:, 0, :embed_dim].set(1.0)   # ln1 weight = 1
    small = small.at[:, 2, :embed_dim].set(1.0)   # ln2 weight = 1

    params["blocks"] = {
        "small": small,
        "qkv_w": jnp.stack(qkv_w),
        "proj_w": jnp.stack(proj_w),
        "fc1_w": jnp.stack(fc1_w),
        "fc2_w": jnp.stack(fc2_w),
    }
    return params


def vit_forward(x, params, *, patch_size, num_heads, return_all_tokens=False):
    """x: (B, C, H, W) float32. Returns cls embedding (B, D) in eval mode."""
    B, C, H, W = x.shape
    ph, pw = patch_size
    nH, nW = H // ph, W // pw
    D = params["patch_w"].shape[1]
    vmem_limit = _vmem_limit_bytes()

    # --- patch extraction (glue) + patch-embed matmul (Pallas, bf16 MXU) ---
    patches = x.reshape(B, C, nH, ph, nW, pw)
    patches = jnp.transpose(patches, (0, 2, 4, 1, 3, 5))      # (B,nH,nW,C,ph,pw)
    patches = patches.reshape(B * nH * nW, C * ph * pw).astype(jnp.bfloat16)
    tok = run_patch_embed(patches, params["patch_w"], params["patch_b"],
                          vmem_limit)
    tok = tok.reshape(B, nH * nW, D)

    # --- cls token + positional embedding (glue; npatch == N so no interp) ---
    # TODO(synk): bicubic pos-embed interpolation for mismatched image sizes
    cls = jnp.broadcast_to(params["cls_token"], (B, 1, D))
    tok = jnp.concatenate([cls, tok], axis=1) + params["pos_embed"]

    # --- pad token count to a multiple of 16 (padded keys masked in-kernel) ---
    n_real = tok.shape[1]
    n_pad = ((n_real + 15) // 16) * 16
    if n_pad != n_real:
        tok = jnp.pad(tok, ((0, 0), (0, n_pad - n_real), (0, 0)))

    # --- all transformer blocks + fused final LayerNorm: one pallas_call ---
    out = run_blocks(tok, params["blocks"], params["final_ln"], num_heads,
                     n_real, return_all_tokens, vmem_limit)

    if return_all_tokens:
        return out[:, :n_real]
    return out[:, 0, :]                                        # (B, D)


# ----------------------------- main ------------------------------------------

if __name__ == "__main__":
    B, C, H, W = 2, 4, 16, 16
    patch_size = (4, 4)
    embed_dim = 32
    depth = 2
    num_heads = 4
    mlp_ratio = 4.0
    num_patches = (H // patch_size[0]) * (W // patch_size[1])   # 16

    key = jax.random.PRNGKey(0)
    kx, kp = jax.random.split(key)
    x = jax.random.normal(kx, (B, C, H, W), jnp.float32)

    params = init_params(
        kp,
        in_chans=C,
        patch_size=patch_size,
        embed_dim=embed_dim,
        depth=depth,
        num_heads=num_heads,
        mlp_ratio=mlp_ratio,
        num_patches=num_patches,
    )

    out = vit_forward(x, params, patch_size=patch_size, num_heads=num_heads)
    out = jax.block_until_ready(out)
    assert out.shape == (B, embed_dim), out.shape
    assert bool(jnp.all(jnp.isfinite(out)))
    print("KERNEL_OK")
</pallas_src>

<mosaic_0001>
module attributes {stable_mosaic.version = 11 : i64} {
  func.func @patch_embed_kernel(%arg0: i32, %arg1: memref<32x64xbf16, #tpu.memory_space<vmem>>, %arg2: memref<64x32xbf16, #tpu.memory_space<vmem>>, %arg3: memref<1x32xf32, #tpu.memory_space<vmem>>, %arg4: memref<32x32xf32, #tpu.memory_space<vmem>>) attributes {dimension_semantics = [#tpu.dimension_semantics<parallel>], iteration_bounds = array<i64: 1>, scalar_prefetch = 0 : i64, scratch_operands = 0 : i64, tpu.core_type = #tpu.core_type<tc>, window_params = [{transform_indices = @transform_0, window_bounds = array<i64: 32, 64>}, {pipeline_mode = #tpu.pipeline_mode<synchronous>, transform_indices = @transform_1, window_bounds = array<i64: 64, 32>}, {pipeline_mode = #tpu.pipeline_mode<synchronous>, transform_indices = @transform_2, window_bounds = array<i64: 1, 32>}, {transform_indices = @transform_3, window_bounds = array<i64: 32, 32>}]} {
    %c0 = arith.constant 0 : index
    %c0_0 = arith.constant 0 : index
    %0 = vector.load %arg1[%c0, %c0_0] : memref<32x64xbf16, #tpu.memory_space<vmem>>, vector<32x64xbf16>
    %c0_1 = arith.constant 0 : index
    %c0_2 = arith.constant 0 : index
    %1 = vector.load %arg2[%c0_1, %c0_2] : memref<64x32xbf16, #tpu.memory_space<vmem>>, vector<64x32xbf16>
    %cst = arith.constant dense<0.000000e+00> : vector<32x32xf32>
    %2 = tpu.matmul %0, %1, %cst {dimension_numbers = #tpu.dot_dimension_numbers<[1], [0], [0], [1], [0, 0, 1, 1], [], []>} : vector<32x64xbf16>, vector<64x32xbf16>, vector<32x32xf32> -> vector<32x32xf32>
    %c0_3 = arith.constant 0 : index
    %c0_4 = arith.constant 0 : index
    %3 = vector.load %arg3[%c0_3, %c0_4] : memref<1x32xf32, #tpu.memory_space<vmem>>, vector<1x32xf32>
    %4 = vector.broadcast %3 : vector<1x32xf32> to vector<32x32xf32>
    %5 = arith.addf %2, %4 : vector<32x32xf32>
    %c0_5 = arith.constant 0 : index
    %c0_6 = arith.constant 0 : index
    %6 = vector.load %arg4[%c0_5, %c0_6] : memref<32x32xf32, #tpu.memory_space<vmem>>, vector<32x32xf32>
    tpu.vector_store %arg4[%c0_5, %c0_6], %5 {strides = array<i32>} : memref<32x32xf32, #tpu.memory_space<vmem>>, vector<32x32xf32>,
    return
  }
  func.func @transform_0(%arg0: i32) -> (i32, i32) {
    %c0_i32 = arith.constant 0 : i32
    %c0_i32_0 = arith.constant 0 : i32
    return %arg0, %c0_i32 : i32, i32
  }
  func.func @transform_1(%arg0: i32) -> (i32, i32) {
    %c0_i32 = arith.constant 0 : i32
    %c0_i32_0 = arith.constant 0 : i32
    %c0_i32_1 = arith.constant 0 : i32
    return %c0_i32, %c0_i32_0 : i32, i32
  }
  func.func @transform_2(%arg0: i32) -> (i32, i32) {
    %c0_i32 = arith.constant 0 : i32
    %c0_i32_0 = arith.constant 0 : i32
    %c0_i32_1 = arith.constant 0 : i32
    return %c0_i32, %c0_i32_0 : i32, i32
  }
  func.func @transform_3(%arg0: i32) -> (i32, i32) {
    %c0_i32 = arith.constant 0 : i32
    %c0_i32_0 = arith.constant 0 : i32
    return %arg0, %c0_i32 : i32, i32
  }
}

</mosaic_0001>

<bundles_post_ra>
// kernel: tpu_custom_call.1
= control target key start
LH: loop header
LB: loop body
LE: loop exit
PB: predicated region body
PF: predicated region fallthrough
CT: control target
= control target key end

     0   :  { %vm69_vm0 = vcmask 523264   ;;  %s251_s0 = inlined_call_operand.vmem [shape: bf16[32,64], index: 0, kind: input, shape index: {}]   ;;  %s252_s1 = inlined_call_operand.vmem [shape: bf16[64,32], index: 1, kind: input, shape index: {}]   ;;  %s253_s2 = inlined_call_operand.vmem [shape: f32[1,32], index: 2, kind: input, shape index: {}]   ;;  %s254_s3 = inlined_call_operand.hbm [shape: f32[32,32], index: 3, kind: output, shape index: {}]  }
   0x1   :  { %v176_v0 = vld [vmem:[%s252_s1 + $0x18] sm:$0xff]   ;;  %v177_v1 = vld [vmem:[%s252_s1 + $0x10] sm:$0xff]   ;;  %v178_v2 = vld [vmem:[%s252_s1 + $0x8] sm:$0xff]  }
   0x2   :  { %161 = vmatprep.subr.bf16.mxu0 %v176_v0  ;;  %v180_v3 = vld [vmem:[%s251_s0] sm:$0xff]  }
   0x3   :  { %162 = vmatpush3.bf16.msra.mxu0 %v176_v0  ;;  %169 = vmatprep.mubr.msk.bf16.mxu0 %vm69_vm0, %v180_v3 }
   0x4   :  { %163 = vmatprep.subr.bf16.mxu0 %v177_v1 }
   0x5   :  { %8 = vsyncpa [#allocation3], 0  ;;  %v179_v4 = vld [vmem:[%s252_s1] sm:$0xff]   ;;  %v181_v5 = vld [vmem:[%s251_s0 + $0x8] sm:$0xff]   ;;  %vm125_vm1 = vcmask 261120   ;;  %s204_s26 = smov [#allocation2]  }
   0x6   :  { %v146_v6 = vld [vmem:[%s253_s2] ss:$0 sm:$0xff]  ;;  %s135_s1 = sshll.u32 %s204_s26, 4  ;;  %s136_s1 = int_to_ptr.vmem [resolvable:$true] %s135_s1 }
   0x7   :  { %164 = vmatpush3.bf16.msra.mxu0 %v177_v1  ;;  %s182_s0 = scalar_lea.vmem %s136_s1, 512  ;;  %p187_p1 = scmp.lt.s32.totalorder %s136_s1, %s136_s1 }
   0x8   :  { %165 = vmatprep.subr.bf16.mxu0 %v178_v2  ;;  %p183_p0 = scmp.ne.s32.totalorder %s136_s1, %s182_s0  ;;  %p188_p2 = scmp.lt.s32.totalorder %s182_s0, %s182_s0 }
   0xa   :  { %p189_p3 = por %p188_p2, %p187_p1 }
   0xb   :  { %166 = vmatpush3.bf16.msra.mxu0 %v178_v2 }
   0xc   :  { %167 = vmatprep.subr.bf16.mxu0 %v179_v4  ;;  %p190_p4 = pnand %p189_p3, %p183_p0 }
   0xf   :  { %168 = vmatpush3.bf16.msra.mxu0 %v179_v4 }
  0x12   :  { %170 = vmatmul.mubr.msk.bf16.vlgmr.msra.gmra.mxu0 %vm69_vm0, %v181_v5 }
  0xd2   :  { %v171_v7 = vpop.f32.mrf.mxu0 }
  0xd3   :  { %v119_v8 = vadd.f32 %v171_v7, %v146_v6 }
  0xd4   :  { %v110_v9 = vpop.f32.mrf.mxu0 }
  0xd5   :  { %128 = vst.msk [vmem:[#allocation2 + $0x10] sm:$0xff] %vm125_vm1, %v119_v8  ;;  %v111_v10 = vadd.f32 %v146_v6, %v110_v9 }
  0xd6   :  { %v172_v11 = vpop.f32.mrf.mxu0 }
  0xd7   :  { %126 = vst.msk [vmem:[#allocation2] sm:$0xff] %vm125_vm1, %v111_v10  ;;  %v122_v12 = vadd.f32 %v172_v11, %v146_v6 }
  0xd8   :  { %v113_v13 = vpop.f32.mrf.mxu0 }
  0xd9   :  { %129 = vst.msk [vmem:[#allocation2 + $0x18] sm:$0xff] %vm125_vm1, %v122_v12  ;;  %v114_v14 = vadd.f32 %v146_v6, %v113_v13 }
  0xdb   :  { %127 = vst.msk [vmem:[#allocation2 + $0x8] sm:$0xff] %vm125_vm1, %v114_v14 }
  0xdc   :  { %193 = shalt.err (!%p190_p4)
}
  0xdd   :  { %s205_s2 = smov 128   ;;  %s206_s27 = smov 8  }
  0xde   :  { %141 = dma.vmem_to_hbm [thread:$0]  %s136_s1, 512, %s254_s3, [#allocation3], %s205_s2, %s205_s2, %s206_s27  }
  0xdf   :  { %202 = dma.done.wait [#allocation3], 512  }
  0xe0   :  { %203 = vsyncadd [#allocation3], 4294966784 }
  0xe1   :  { %145 = vsyncpa [#allocation3], 1 }

</bundles_post_ra>
